<compile_context>
chip_gen: v6e
topology: v6e:2x2x1
jax: 0.10.0
libtpu: 0.0.40
codegen_flags: <defaults>
</compile_context>

<pallas_src>
import functools
import math

import jax
import jax.numpy as jnp
from jax import lax
from jax.experimental import pallas as pl
from jax.experimental.pallas import tpu as pltpu


def _pick_q_tile(seq_len):
    """Largest nice query tile that divides the sequence length."""
    for t in (512, 256, 128):
        if seq_len % t == 0:
            return t
    return seq_len


def _attention_kernel(x_seq_ref, x_q_ref, w_ref, b_ref, o_ref, k_ref, v_ref, *,
                      num_heads, head_dim):
    """One (batch, query-tile) grid step.

    x_seq_ref: (1, S, H)   full-sequence activations (DMA'd once per batch elem)
    x_q_ref:   (1, TQ, H)  this query tile's activations (pipelined over qt)
    w_ref:     (3, H, H)   [Wq*scale, Wk, Wv], already transposed to (in, out)
    b_ref:     (3, 1, H)   [bq*scale, bk, bv], f32
    o_ref:     (1, TQ, H)  output tile
    k_ref/v_ref: (S, H)    persistent VMEM scratch, carried across query tiles
    """
    qt = pl.program_id(1)
    cdt = x_q_ref.dtype                      # matmul operand dtype (bf16 default)

    # ---- K / V projection for the whole sequence: once per batch element. ----
    @pl.when(qt == 0)
    def _():
        x_seq = x_seq_ref[0]                                              # (S, H)
        k = jnp.dot(x_seq, w_ref[1], preferred_element_type=jnp.float32) + b_ref[1]
        v = jnp.dot(x_seq, w_ref[2], preferred_element_type=jnp.float32) + b_ref[2]
        k_ref[...] = k.astype(cdt)
        v_ref[...] = v.astype(cdt)

    # ---- Q projection for this tile (softmax scale already folded in). ----
    q = jnp.dot(x_q_ref[0], w_ref[0], preferred_element_type=jnp.float32) + b_ref[0]
    q = q.astype(cdt)                                                     # (TQ, H)

    # ---- Per-head attention (static unroll; see header comment). ----
    for h in range(num_heads):
        lo, hi = h * head_dim, (h + 1) * head_dim
        q_h = q[:, lo:hi]                                                 # (TQ, hd)
        k_h = k_ref[:, lo:hi]                                             # (S, hd)
        v_h = v_ref[:, lo:hi]                                             # (S, hd)

        # scores = q @ k^T (f32 accumulation, no materialized transpose)
        s = lax.dot_general(q_h, k_h, (((1,), (1,)), ((), ())),
                            preferred_element_type=jnp.float32)           # (TQ, S)
        # Numerically-stable softmax; normalization deferred to the context.
        s = s - jnp.max(s, axis=-1, keepdims=True)
        p = jnp.exp(s)
        denom = jnp.sum(p, axis=-1, keepdims=True)                        # (TQ, 1)
        # TODO(synk): training-mode dropout on attention probs would use
        # pltpu.prng_seed + pltpu.prng_random_bits; eval mode is identity.
        ctx = jnp.dot(p.astype(cdt), v_h,
                      preferred_element_type=jnp.float32)                 # (TQ, hd)
        ctx = ctx * pl.reciprocal(denom, approx=True)
        o_ref[0, :, lo:hi] = ctx.astype(o_ref.dtype)


def _vmem_limit_bytes():
    # ~75% of per-core VMEM: ~96 MiB on v5e/v6e (128 MiB), ~48 MiB on v7x (64 MiB).
    try:
        cap = pltpu.get_tpu_info().vmem_capacity_bytes
    except Exception:
        cap = 64 * 1024 * 1024
    return int(cap * 3 // 4)


def gutnet_self_attention(hidden_states, w_q, b_q, w_k, b_k, w_v, b_v, *,
                          num_heads, compute_dtype=jnp.bfloat16):
    """hidden_states: [B, S, H] or [S, H]; w_*: PyTorch nn.Linear layout (out, in)."""
    squeeze_batch = hidden_states.ndim == 2
    if squeeze_batch:
        hidden_states = hidden_states[None]
    B, S, H = hidden_states.shape
    assert H % num_heads == 0, "hidden_size must be divisible by num_heads"
    head_dim = H // num_heads
    out_dtype = hidden_states.dtype

    # -- Weight prep (hoist to param-prep time in a real model). ------------
    # Fold 1/sqrt(head_dim) into Wq / bq in f32, *then* cast matmul operands
    # to bf16; biases stay f32 for the f32-accumulator add inside the kernel.
    scale = 1.0 / math.sqrt(head_dim)
    wq32 = w_q.astype(jnp.float32) * scale
    bq32 = b_q.astype(jnp.float32) * scale
    w_qkv = jnp.stack(
        [wq32.T, w_k.astype(jnp.float32).T, w_v.astype(jnp.float32).T],
        axis=0).astype(compute_dtype)                                  # (3, H, H)
    b_qkv = jnp.stack(
        [bq32, b_k.astype(jnp.float32), b_v.astype(jnp.float32)],
        axis=0).reshape(3, 1, H)                                       # (3, 1, H) f32

    x = hidden_states.astype(compute_dtype)

    tq = _pick_q_tile(S)
    n_qt = S // tq

    kernel = functools.partial(_attention_kernel, num_heads=num_heads,
                               head_dim=head_dim)

    cd_size = jnp.dtype(compute_dtype).itemsize
    cost = pl.CostEstimate(
        flops=int(6 * B * S * H * H + 4 * B * S * S * H),
        transcendentals=int(B * num_heads * S * S),
        bytes_accessed=int(B * S * H * (cd_size + jnp.dtype(out_dtype).itemsize)
                           + 3 * H * H * cd_size + 3 * H * 4),
    )

    out = pl.pallas_call(
        kernel,
        out_shape=jax.ShapeDtypeStruct((B, S, H), out_dtype),
        grid_spec=pltpu.PrefetchScalarGridSpec(
            num_scalar_prefetch=0,
            grid=(B, n_qt),
            in_specs=[
                # Full-sequence activations for the K/V projection; index map is
                # constant across query tiles so they are only DMA'd once per b.
                pl.BlockSpec((1, S, H), lambda b, q: (b, 0, 0)),
                # This query tile's activations (pipelined across qt).
                pl.BlockSpec((1, tq, H), lambda b, q: (b, q, 0)),
                # Fused [Wq*scale | Wk | Wv] weight and bias: resident operands.
                # TODO(synk): pipeline_mode=pl.Buffered(1) would drop their second
                # buffer; K-tile over H (reduction grid axis + f32 accumulator)
                # for H >~ 2k on v7x's 64 MiB VMEM.
                pl.BlockSpec((3, H, H), lambda b, q: (0, 0, 0)),
                pl.BlockSpec((3, 1, H), lambda b, q: (0, 0, 0)),
            ],
            out_specs=pl.BlockSpec((1, tq, H), lambda b, q: (b, q, 0)),
            scratch_shapes=[pltpu.VMEM((S, H), compute_dtype),   # K (per batch elem)
                            pltpu.VMEM((S, H), compute_dtype)],  # V (per batch elem)
        ),
        compiler_params=pltpu.CompilerParams(
            # Batch is megacore-parallel; the query-tile axis carries the K/V
            # scratch so it must stay "arbitrary".
            dimension_semantics=("parallel", "arbitrary"),
            vmem_limit_bytes=_vmem_limit_bytes(),
        ),
        cost_estimate=cost,
    )(x, x, w_qkv, b_qkv)

    if squeeze_batch:
        out = out[0]
    return out


def _reference(hidden_states, w_q, b_q, w_k, b_k, w_v, b_v, num_heads):
    """Pure-f32 JAX reference matching the PyTorch module."""
    B, S, H = hidden_states.shape
    hd = H // num_heads

    def proj(w, b):
        y = jnp.einsum("bsh,oh->bso", hidden_states, w) + b
        return y.reshape(B, S, num_heads, hd).transpose(0, 2, 1, 3)   # (B, nh, S, hd)

    q, k, v = proj(w_q, b_q), proj(w_k, b_k), proj(w_v, b_v)
    scores = jnp.einsum("bnqd,bnkd->bnqk", q, k) / math.sqrt(hd)
    probs = jax.nn.softmax(scores, axis=-1)
    ctx = jnp.einsum("bnqk,bnkd->bnqd", probs, v)
    return ctx.transpose(0, 2, 1, 3).reshape(B, S, H)


if __name__ == "__main__":
    # Small config: batch=2, seq=8, hidden=32, heads=4 (head_dim=8)
    B, S, H, NH = 2, 8, 32, 4

    key = jax.random.PRNGKey(0)
    ks = jax.random.split(key, 7)

    hidden_states = jax.random.normal(ks[0], (B, S, H), dtype=jnp.float32)

    bound = 1.0 / math.sqrt(H)

    def init_linear(kw, kb):
        w = jax.random.uniform(kw, (H, H), minval=-bound, maxval=bound,
                               dtype=jnp.float32)          # PyTorch (out, in)
        b = jax.random.uniform(kb, (H,), minval=-bound, maxval=bound,
                               dtype=jnp.float32)
        return w, b

    w_q, b_q = init_linear(ks[1], ks[2])
    w_k, b_k = init_linear(ks[3], ks[4])
    w_v, b_v = init_linear(ks[5], ks[6])

    out = gutnet_self_attention(hidden_states, w_q, b_q, w_k, b_k, w_v, b_v,
                                num_heads=NH)
    out = jax.block_until_ready(out)

    ref = _reference(hidden_states, w_q, b_q, w_k, b_k, w_v, b_v, NH)
    assert out.shape == (B, S, H)
    assert out.dtype == hidden_states.dtype
    max_err = float(jnp.max(jnp.abs(out.astype(jnp.float32) - ref)))
    # bf16 matmul operands + approximate reciprocal vs. a pure-f32 reference.
    assert max_err < 2e-2, f"mismatch vs reference (max abs err {max_err})"

    print("KERNEL_OK")
</pallas_src>

<mosaic_0001>
module attributes {stable_mosaic.version = 11 : i64} {
  func.func @_attention_kernel(%arg0: i32, %arg1: i32, %arg2: memref<1x8x32xbf16, #tpu.memory_space<vmem>>, %arg3: memref<1x8x32xbf16, #tpu.memory_space<vmem>>, %arg4: memref<3x32x32xbf16, #tpu.memory_space<vmem>>, %arg5: memref<3x1x32xf32, #tpu.memory_space<vmem>>, %arg6: memref<1x8x32xf32, #tpu.memory_space<vmem>>, %arg7: memref<8x32xbf16, #tpu.memory_space<vmem>>, %arg8: memref<8x32xbf16, #tpu.memory_space<vmem>>) attributes {dimension_semantics = [#tpu.dimension_semantics<parallel>, #tpu.dimension_semantics<arbitrary>], iteration_bounds = array<i64: 2, 1>, scalar_prefetch = 0 : i64, scratch_operands = 2 : i64, tpu.core_type = #tpu.core_type<tc>, window_params = [{transform_indices = @transform_0, window_bounds = array<i64: 1, 8, 32>}, {transform_indices = @transform_1, window_bounds = array<i64: 1, 8, 32>}, {pipeline_mode = #tpu.pipeline_mode<synchronous>, transform_indices = @transform_2, window_bounds = array<i64: 3, 32, 32>}, {pipeline_mode = #tpu.pipeline_mode<synchronous>, transform_indices = @transform_3, window_bounds = array<i64: 3, 1, 32>}, {transform_indices = @transform_4, window_bounds = array<i64: 1, 8, 32>}]} {
    %c0_i32 = arith.constant 0 : i32
    %0 = arith.cmpi eq, %arg1, %c0_i32 : i32
    %1 = arith.extui %0 : i1 to i32
    %c0_i32_0 = arith.constant 0 : i32
    %2 = arith.cmpi ne, %1, %c0_i32_0 : i32
    scf.if %2 {
      %c0_50 = arith.constant 0 : index
      %c0_51 = arith.constant 0 : index
      %c0_52 = arith.constant 0 : index
      %89 = vector.load %arg2[%c0_50, %c0_51, %c0_52] : memref<1x8x32xbf16, #tpu.memory_space<vmem>>, vector<1x8x32xbf16>
      %90 = vector.shape_cast %89 : vector<1x8x32xbf16> to vector<8x32xbf16>
      %c1 = arith.constant 1 : index
      %c0_53 = arith.constant 0 : index
      %c0_54 = arith.constant 0 : index
      %91 = vector.load %arg4[%c1, %c0_53, %c0_54] : memref<3x32x32xbf16, #tpu.memory_space<vmem>>, vector<1x32x32xbf16>
      %92 = vector.shape_cast %91 : vector<1x32x32xbf16> to vector<32x32xbf16>
      %cst_55 = arith.constant dense<0.000000e+00> : vector<8x32xf32>
      %93 = tpu.matmul %90, %92, %cst_55 {dimension_numbers = #tpu.dot_dimension_numbers<[1], [0], [0], [1], [0, 0, 1, 1], [], []>} : vector<8x32xbf16>, vector<32x32xbf16>, vector<8x32xf32> -> vector<8x32xf32>
      %c1_56 = arith.constant 1 : index
      %c0_57 = arith.constant 0 : index
      %c0_58 = arith.constant 0 : index
      %94 = vector.load %arg5[%c1_56, %c0_57, %c0_58] : memref<3x1x32xf32, #tpu.memory_space<vmem>>, vector<1x1x32xf32>
      %95 = vector.shape_cast %94 : vector<1x1x32xf32> to vector<1x32xf32>
      %96 = vector.broadcast %95 : vector<1x32xf32> to vector<8x32xf32>
      %97 = arith.addf %93, %96 : vector<8x32xf32>
      %c2 = arith.constant 2 : index
      %c0_59 = arith.constant 0 : index
      %c0_60 = arith.constant 0 : index
      %98 = vector.load %arg4[%c2, %c0_59, %c0_60] : memref<3x32x32xbf16, #tpu.memory_space<vmem>>, vector<1x32x32xbf16>
      %99 = vector.shape_cast %98 : vector<1x32x32xbf16> to vector<32x32xbf16>
      %cst_61 = arith.constant dense<0.000000e+00> : vector<8x32xf32>
      %100 = tpu.matmul %90, %99, %cst_61 {dimension_numbers = #tpu.dot_dimension_numbers<[1], [0], [0], [1], [0, 0, 1, 1], [], []>} : vector<8x32xbf16>, vector<32x32xbf16>, vector<8x32xf32> -> vector<8x32xf32>
      %c2_62 = arith.constant 2 : index
      %c0_63 = arith.constant 0 : index
      %c0_64 = arith.constant 0 : index
      %101 = vector.load %arg5[%c2_62, %c0_63, %c0_64] : memref<3x1x32xf32, #tpu.memory_space<vmem>>, vector<1x1x32xf32>
      %102 = vector.shape_cast %101 : vector<1x1x32xf32> to vector<1x32xf32>
      %103 = vector.broadcast %102 : vector<1x32xf32> to vector<8x32xf32>
      %104 = arith.addf %100, %103 : vector<8x32xf32>
      %105 = arith.truncf %97 : vector<8x32xf32> to vector<8x32xbf16>
      %c0_65 = arith.constant 0 : index
      %c0_66 = arith.constant 0 : index
      %106 = vector.load %arg7[%c0_65, %c0_66] : memref<8x32xbf16, #tpu.memory_space<vmem>>, vector<8x32xbf16>
      tpu.vector_store %arg7[%c0_65, %c0_66], %105 {strides = array<i32>} : memref<8x32xbf16, #tpu.memory_space<vmem>>, vector<8x32xbf16>,
      %107 = arith.truncf %104 : vector<8x32xf32> to vector<8x32xbf16>
      %c0_67 = arith.constant 0 : index
      %c0_68 = arith.constant 0 : index
      %108 = vector.load %arg8[%c0_67, %c0_68] : memref<8x32xbf16, #tpu.memory_space<vmem>>, vector<8x32xbf16>
      tpu.vector_store %arg8[%c0_67, %c0_68], %107 {strides = array<i32>} : memref<8x32xbf16, #tpu.memory_space<vmem>>, vector<8x32xbf16>,
    } else {
    }
    %c0 = arith.constant 0 : index
    %c0_1 = arith.constant 0 : index
    %c0_2 = arith.constant 0 : index
    %3 = vector.load %arg3[%c0, %c0_1, %c0_2] : memref<1x8x32xbf16, #tpu.memory_space<vmem>>, vector<1x8x32xbf16>
    %4 = vector.shape_cast %3 : vector<1x8x32xbf16> to vector<8x32xbf16>
    %c0_3 = arith.constant 0 : index
    %c0_4 = arith.constant 0 : index
    %c0_5 = arith.constant 0 : index
    %5 = vector.load %arg4[%c0_3, %c0_4, %c0_5] : memref<3x32x32xbf16, #tpu.memory_space<vmem>>, vector<1x32x32xbf16>
    %6 = vector.shape_cast %5 : vector<1x32x32xbf16> to vector<32x32xbf16>
    %cst = arith.constant dense<0.000000e+00> : vector<8x32xf32>
    %7 = tpu.matmul %4, %6, %cst {dimension_numbers = #tpu.dot_dimension_numbers<[1], [0], [0], [1], [0, 0, 1, 1], [], []>} : vector<8x32xbf16>, vector<32x32xbf16>, vector<8x32xf32> -> vector<8x32xf32>
    %c0_6 = arith.constant 0 : index
    %c0_7 = arith.constant 0 : index
    %c0_8 = arith.constant 0 : index
    %8 = vector.load %arg5[%c0_6, %c0_7, %c0_8] : memref<3x1x32xf32, #tpu.memory_space<vmem>>, vector<1x1x32xf32>
    %9 = vector.shape_cast %8 : vector<1x1x32xf32> to vector<1x32xf32>
    %10 = vector.broadcast %9 : vector<1x32xf32> to vector<8x32xf32>
    %11 = arith.addf %7, %10 : vector<8x32xf32>
    %12 = arith.truncf %11 : vector<8x32xf32> to vector<8x32xbf16>
    %13 = vector.extract_strided_slice %12 {offsets = [0, 0], sizes = [8, 8], strides = [1, 1]} : vector<8x32xbf16> to vector<8x8xbf16>
    %c0_9 = arith.constant 0 : index
    %c0_10 = arith.constant 0 : index
    %14 = vector.load %arg7[%c0_9, %c0_10] : memref<8x32xbf16, #tpu.memory_space<vmem>>, vector<8x8xbf16>
    %c0_11 = arith.constant 0 : index
    %c0_12 = arith.constant 0 : index
    %15 = vector.load %arg8[%c0_11, %c0_12] : memref<8x32xbf16, #tpu.memory_space<vmem>>, vector<8x8xbf16>
    %cst_13 = arith.constant dense<0.000000e+00> : vector<8x8xf32>
    %16 = tpu.matmul %13, %14, %cst_13 {dimension_numbers = #tpu.dot_dimension_numbers<[1], [1], [0], [0], [0, 0, 1, 0], [], []>} : vector<8x8xbf16>, vector<8x8xbf16>, vector<8x8xf32> -> vector<8x8xf32>
    %cst_14 = arith.constant dense<0xFF800000> : vector<8xf32>
    %17 = vector.multi_reduction <maximumf>, %16, %cst_14 [1] : vector<8x8xf32> to vector<8xf32>
    %18 = vector.shape_cast %17 : vector<8xf32> to vector<8x1xf32>
    %19 = vector.broadcast %18 : vector<8x1xf32> to vector<8x8xf32>
    %20 = arith.subf %16, %19 : vector<8x8xf32>
    %21 = math.exp %20 : vector<8x8xf32>
    %cst_15 = arith.constant dense<0.000000e+00> : vector<8xf32>
    %22 = vector.multi_reduction <add>, %21, %cst_15 [1] : vector<8x8xf32> to vector<8xf32>
    %23 = vector.shape_cast %22 : vector<8xf32> to vector<8x1xf32>
    %24 = arith.truncf %21 : vector<8x8xf32> to vector<8x8xbf16>
    %cst_16 = arith.constant dense<0.000000e+00> : vector<8x8xf32>
    %25 = tpu.matmul %24, %15, %cst_16 {dimension_numbers = #tpu.dot_dimension_numbers<[1], [0], [0], [1], [0, 0, 1, 1], [], []>} : vector<8x8xbf16>, vector<8x8xbf16>, vector<8x8xf32> -> vector<8x8xf32>
    %26 = tpu.reciprocal %23 {approx = true} : vector<8x1xf32> -> vector<8x1xf32>
    %27 = vector.broadcast %26 : vector<8x1xf32> to vector<8x8xf32>
    %28 = arith.mulf %25, %27 : vector<8x8xf32>
    %c0_17 = arith.constant 0 : index
    %c0_18 = arith.constant 0 : index
    %c0_19 = arith.constant 0 : index
    %29 = vector.load %arg6[%c0_17, %c0_18, %c0_19] : memref<1x8x32xf32, #tpu.memory_space<vmem>>, vector<1x8x8xf32>
    %30 = vector.shape_cast %29 : vector<1x8x8xf32> to vector<8x8xf32>
    %31 = vector.shape_cast %28 : vector<8x8xf32> to vector<1x8x8xf32>
    tpu.vector_store %arg6[%c0_17, %c0_18, %c0_19], %31 {strides = array<i32>} : memref<1x8x32xf32, #tpu.memory_space<vmem>>, vector<1x8x8xf32>,
    %32 = vector.extract_strided_slice %12 {offsets = [0, 8], sizes = [8, 8], strides = [1, 1]} : vector<8x32xbf16> to vector<8x8xbf16>
    %c0_20 = arith.constant 0 : index
    %c8 = arith.constant 8 : index
    %33 = vector.load %arg7[%c0_20, %c8] : memref<8x32xbf16, #tpu.memory_space<vmem>>, vector<8x8xbf16>
    %c0_21 = arith.constant 0 : index
    %c8_22 = arith.constant 8 : index
    %34 = vector.load %arg8[%c0_21, %c8_22] : memref<8x32xbf16, #tpu.memory_space<vmem>>, vector<8x8xbf16>
    %cst_23 = arith.constant dense<0.000000e+00> : vector<8x8xf32>
    %35 = tpu.matmul %32, %33, %cst_23 {dimension_numbers = #tpu.dot_dimension_numbers<[1], [1], [0], [0], [0, 0, 1, 0], [], []>} : vector<8x8xbf16>, vector<8x8xbf16>, vector<8x8xf32> -> vector<8x8xf32>
    %cst_24 = arith.constant dense<0xFF800000> : vector<8xf32>
    %36 = vector.multi_reduction <maximumf>, %35, %cst_24 [1] : vector<8x8xf32> to vector<8xf32>
    %37 = vector.shape_cast %36 : vector<8xf32> to vector<8x1xf32>
    %38 = vector.broadcast %37 : vector<8x1xf32> to vector<8x8xf32>
    %39 = arith.subf %35, %38 : vector<8x8xf32>
    %40 = math.exp %39 : vector<8x8xf32>
    %cst_25 = arith.constant dense<0.000000e+00> : vector<8xf32>
    %41 = vector.multi_reduction <add>, %40, %cst_25 [1] : vector<8x8xf32> to vector<8xf32>
    %42 = vector.shape_cast %41 : vector<8xf32> to vector<8x1xf32>
    %43 = arith.truncf %40 : vector<8x8xf32> to vector<8x8xbf16>
    %cst_26 = arith.constant dense<0.000000e+00> : vector<8x8xf32>
    %44 = tpu.matmul %43, %34, %cst_26 {dimension_numbers = #tpu.dot_dimension_numbers<[1], [0], [0], [1], [0, 0, 1, 1], [], []>} : vector<8x8xbf16>, vector<8x8xbf16>, vector<8x8xf32> -> vector<8x8xf32>
    %45 = tpu.reciprocal %42 {approx = true} : vector<8x1xf32> -> vector<8x1xf32>
    %46 = vector.broadcast %45 : vector<8x1xf32> to vector<8x8xf32>
    %47 = arith.mulf %44, %46 : vector<8x8xf32>
    %c0_27 = arith.constant 0 : index
    %c0_28 = arith.constant 0 : index
    %c8_29 = arith.constant 8 : index
    %48 = vector.load %arg6[%c0_27, %c0_28, %c8_29] : memref<1x8x32xf32, #tpu.memory_space<vmem>>, vector<1x8x8xf32>
    %49 = vector.shape_cast %48 : vector<1x8x8xf32> to vector<8x8xf32>
    %50 = vector.shape_cast %47 : vector<8x8xf32> to vector<1x8x8xf32>
    tpu.vector_store %arg6[%c0_27, %c0_28, %c8_29], %50 {strides = array<i32>} : memref<1x8x32xf32, #tpu.memory_space<vmem>>, vector<1x8x8xf32>,
    %51 = vector.extract_strided_slice %12 {offsets = [0, 16], sizes = [8, 8], strides = [1, 1]} : vector<8x32xbf16> to vector<8x8xbf16>
    %c0_30 = arith.constant 0 : index
    %c16 = arith.constant 16 : index
    %52 = vector.load %arg7[%c0_30, %c16] : memref<8x32xbf16, #tpu.memory_space<vmem>>, vector<8x8xbf16>
    %c0_31 = arith.constant 0 : index
    %c16_32 = arith.constant 16 : index
    %53 = vector.load %arg8[%c0_31, %c16_32] : memref<8x32xbf16, #tpu.memory_space<vmem>>, vector<8x8xbf16>
    %cst_33 = arith.constant dense<0.000000e+00> : vector<8x8xf32>
    %54 = tpu.matmul %51, %52, %cst_33 {dimension_numbers = #tpu.dot_dimension_numbers<[1], [1], [0], [0], [0, 0, 1, 0], [], []>} : vector<8x8xbf16>, vector<8x8xbf16>, vector<8x8xf32> -> vector<8x8xf32>
    %cst_34 = arith.constant dense<0xFF800000> : vector<8xf32>
    %55 = vector.multi_reduction <maximumf>, %54, %cst_34 [1] : vector<8x8xf32> to vector<8xf32>
    %56 = vector.shape_cast %55 : vector<8xf32> to vector<8x1xf32>
    %57 = vector.broadcast %56 : vector<8x1xf32> to vector<8x8xf32>
    %58 = arith.subf %54, %57 : vector<8x8xf32>
    %59 = math.exp %58 : vector<8x8xf32>
    %cst_35 = arith.constant dense<0.000000e+00> : vector<8xf32>
    %60 = vector.multi_reduction <add>, %59, %cst_35 [1] : vector<8x8xf32> to vector<8xf32>
    %61 = vector.shape_cast %60 : vector<8xf32> to vector<8x1xf32>
    %62 = arith.truncf %59 : vector<8x8xf32> to vector<8x8xbf16>
    %cst_36 = arith.constant dense<0.000000e+00> : vector<8x8xf32>
    %63 = tpu.matmul %62, %53, %cst_36 {dimension_numbers = #tpu.dot_dimension_numbers<[1], [0], [0], [1], [0, 0, 1, 1], [], []>} : vector<8x8xbf16>, vector<8x8xbf16>, vector<8x8xf32> -> vector<8x8xf32>
    %64 = tpu.reciprocal %61 {approx = true} : vector<8x1xf32> -> vector<8x1xf32>
    %65 = vector.broadcast %64 : vector<8x1xf32> to vector<8x8xf32>
    %66 = arith.mulf %63, %65 : vector<8x8xf32>
    %c0_37 = arith.constant 0 : index
    %c0_38 = arith.constant 0 : index
    %c16_39 = arith.constant 16 : index
    %67 = vector.load %arg6[%c0_37, %c0_38, %c16_39] : memref<1x8x32xf32, #tpu.memory_space<vmem>>, vector<1x8x8xf32>
    %68 = vector.shape_cast %67 : vector<1x8x8xf32> to vector<8x8xf32>
    %69 = vector.shape_cast %66 : vector<8x8xf32> to vector<1x8x8xf32>
    tpu.vector_store %arg6[%c0_37, %c0_38, %c16_39], %69 {strides = array<i32>} : memref<1x8x32xf32, #tpu.memory_space<vmem>>, vector<1x8x8xf32>,
    %70 = vector.extract_strided_slice %12 {offsets = [0, 24], sizes = [8, 8], strides = [1, 1]} : vector<8x32xbf16> to vector<8x8xbf16>
    %c0_40 = arith.constant 0 : index
    %c24 = arith.constant 24 : index
    %71 = vector.load %arg7[%c0_40, %c24] : memref<8x32xbf16, #tpu.memory_space<vmem>>, vector<8x8xbf16>
    %c0_41 = arith.constant 0 : index
    %c24_42 = arith.constant 24 : index
    %72 = vector.load %arg8[%c0_41, %c24_42] : memref<8x32xbf16, #tpu.memory_space<vmem>>, vector<8x8xbf16>
    %cst_43 = arith.constant dense<0.000000e+00> : vector<8x8xf32>
    %73 = tpu.matmul %70, %71, %cst_43 {dimension_numbers = #tpu.dot_dimension_numbers<[1], [1], [0], [0], [0, 0, 1, 0], [], []>} : vector<8x8xbf16>, vector<8x8xbf16>, vector<8x8xf32> -> vector<8x8xf32>
    %cst_44 = arith.constant dense<0xFF800000> : vector<8xf32>
    %74 = vector.multi_reduction <maximumf>, %73, %cst_44 [1] : vector<8x8xf32> to vector<8xf32>
    %75 = vector.shape_cast %74 : vector<8xf32> to vector<8x1xf32>
    %76 = vector.broadcast %75 : vector<8x1xf32> to vector<8x8xf32>
    %77 = arith.subf %73, %76 : vector<8x8xf32>
    %78 = math.exp %77 : vector<8x8xf32>
    %cst_45 = arith.constant dense<0.000000e+00> : vector<8xf32>
    %79 = vector.multi_reduction <add>, %78, %cst_45 [1] : vector<8x8xf32> to vector<8xf32>
    %80 = vector.shape_cast %79 : vector<8xf32> to vector<8x1xf32>
    %81 = arith.truncf %78 : vector<8x8xf32> to vector<8x8xbf16>
    %cst_46 = arith.constant dense<0.000000e+00> : vector<8x8xf32>
    %82 = tpu.matmul %81, %72, %cst_46 {dimension_numbers = #tpu.dot_dimension_numbers<[1], [0], [0], [1], [0, 0, 1, 1], [], []>} : vector<8x8xbf16>, vector<8x8xbf16>, vector<8x8xf32> -> vector<8x8xf32>
    %83 = tpu.reciprocal %80 {approx = true} : vector<8x1xf32> -> vector<8x1xf32>
    %84 = vector.broadcast %83 : vector<8x1xf32> to vector<8x8xf32>
    %85 = arith.mulf %82, %84 : vector<8x8xf32>
    %c0_47 = arith.constant 0 : index
    %c0_48 = arith.constant 0 : index
    %c24_49 = arith.constant 24 : index
    %86 = vector.load %arg6[%c0_47, %c0_48, %c24_49] : memref<1x8x32xf32, #tpu.memory_space<vmem>>, vector<1x8x8xf32>
    %87 = vector.shape_cast %86 : vector<1x8x8xf32> to vector<8x8xf32>
    %88 = vector.shape_cast %85 : vector<8x8xf32> to vector<1x8x8xf32>
    tpu.vector_store %arg6[%c0_47, %c0_48, %c24_49], %88 {strides = array<i32>} : memref<1x8x32xf32, #tpu.memory_space<vmem>>, vector<1x8x8xf32>,
    return
  }
  func.func @transform_0(%arg0: i32, %arg1: i32) -> (i32, i32, i32) {
    %c0_i32 = arith.constant 0 : i32
    %c0_i32_0 = arith.constant 0 : i32
    %c0_i32_1 = arith.constant 0 : i32
    return %arg0, %c0_i32, %c0_i32_0 : i32, i32, i32
  }
  func.func @transform_1(%arg0: i32, %arg1: i32) -> (i32, i32, i32) {
    %c0_i32 = arith.constant 0 : i32
    %c0_i32_0 = arith.constant 0 : i32
    return %arg0, %arg1, %c0_i32 : i32, i32, i32
  }
  func.func @transform_2(%arg0: i32, %arg1: i32) -> (i32, i32, i32) {
    %c0_i32 = arith.constant 0 : i32
    %c0_i32_0 = arith.constant 0 : i32
    %c0_i32_1 = arith.constant 0 : i32
    %c0_i32_2 = arith.constant 0 : i32
    return %c0_i32, %c0_i32_0, %c0_i32_1 : i32, i32, i32
  }
  func.func @transform_3(%arg0: i32, %arg1: i32) -> (i32, i32, i32) {
    %c0_i32 = arith.constant 0 : i32
    %c0_i32_0 = arith.constant 0 : i32
    %c0_i32_1 = arith.constant 0 : i32
    %c0_i32_2 = arith.constant 0 : i32
    return %c0_i32, %c0_i32_0, %c0_i32_1 : i32, i32, i32
  }
  func.func @transform_4(%arg0: i32, %arg1: i32) -> (i32, i32, i32) {
    %c0_i32 = arith.constant 0 : i32
    %c0_i32_0 = arith.constant 0 : i32
    return %arg0, %arg1, %c0_i32 : i32, i32, i32
  }
}

</mosaic_0001>

<bundles_post_ra>
// kernel: tpu_custom_call.1
= control target key start
LH: loop header
LB: loop body
LE: loop exit
PB: predicated region body
PF: predicated region fallthrough
CT: control target
= control target key end

     0   :  { %s1855_s0 = inlined_call_operand.hbm [shape: bf16[2,8,32], index: 0, kind: input, shape index: {}]   ;;  %s1856_s1 = inlined_call_operand.hbm [shape: bf16[2,8,32], index: 1, kind: input, shape index: {}]   ;;  %s1857_s2 = inlined_call_operand.hbm [shape: bf16[3,32,32], index: 2, kind: input, shape index: {}]   ;;  %s1858_s3 = inlined_call_operand.vmem [shape: f32[3,1,32], index: 3, kind: input, shape index: {}]   ;;  %s1859_s4 = inlined_call_operand.hbm [shape: f32[2,8,32], index: 4, kind: output, shape index: {}]  }
   0x1   :  { %1861 = sst [smem:[#allocation16_spill]] %s1857_s2 }
   0x2   :  { %9 = vsyncpa [#allocation5], 0 }
   0x3   :  { %11 = vsyncpa [#allocation5 + $0x1], 0 }
   0x4   :  { %12 = vsyncpa [#allocation8], 0 }
   0x5   :  { %14 = vsyncpa [#allocation8 + $0x1], 0 }
   0x6   :  { %15 = vsyncpa [#allocation6], 0 }
   0x7   :  { %17 = vsyncpa [#allocation6 + $0x1], 0  ;;  %s1574_s15 = smov 0   ;;  %s1576_s16 = smov 0  }
   0x8   :  { %s1578_s17 = smov 0   ;;  %s1580_s18 = smov 0  }
   0x9   :  { %s1582_s19 = smov 0   ;;  %s1584_s20 = smov 0  }
   0xa LB: > { %s1605_s21 = sadd.s32 4294967295, %s1533_s20   ;;  %s1105_s22 = sadd.s32 4294967294, %s1533_s20   ;;  %s1533_s20 = sphi %s1584_s20, %s23_s20   ;;  %s1529_s19 = sphi %s1582_s19, %s1879_s19   ;;  %s1525_s18 = sphi %s1580_s18, %s1878_s18   ;;  %s1521_s17 = sphi %s1578_s17, %s1877_s17   ;;  %s1517_s16 = sphi %s1576_s16, %s1876_s16   ;;  %s1513_s15 = sphi %s1574_s15, %s1875_s15  }
   0xb   : > { %p55_p0 = scmp.ne.s32.totalorder %s1517_s16, %s1513_s15  ;;  %p56_p1 = scmp.eq.s32.totalorder %s1605_s21, 0 }
   0xc   : > { %p157_p3 = scmp.eq.s32.totalorder %s1105_s22, 1  ;;  %p1106_p5 = scmp.ge.s32.totalorder %s1533_s20, 1 }
   0xd   : > { %p1614_p4 = por %p56_p1, %p55_p0  ;;  %p164_p7 = scmp.lt.s32.totalorder %s1533_s20, 3 }
   0xe   : > { %p1619_p6 = por %p157_p3, %p55_p0  ;;  %s1535_s26 = smov [#allocation9]  }
   0xf   : > { %p1624_p8 = pnand %p1106_p5, %p164_p7  ;;  %s176_s27 = sshll.u32 %s1535_s26, 4  ;;  %s177_s27 = int_to_ptr.vmem [resolvable:$true] %s176_s27 }
  0x10   : > { %s1863_s24 = scalar_select %p1619_p6, 1, 0 }
  0x11   : > { %p1257_p9 = pneg %p1624_p8  ;;  %s35_s29 = sadd.s32 1, %s1529_s19 }
  0x12   : > { %s1374_s30 = scalar_lea.vmem %s177_s27, 768  ;;  %p1382_p5 = scmp.lt.s32.totalorder %s177_s27, %s177_s27 }
  0x13   : > { %p1633_p11 = pnand %p1257_p9, %p56_p1  ;;  %p1375_p13 = scmp.ne.s32.totalorder %s177_s27, %s1374_s30 }
  0x14   : > { %p1383_p7 = scmp.lt.s32.totalorder %s1374_s30, %s1374_s30 }
  0x15   : > { %p1365_p12 = pneg %p1633_p11 }
  0x16   : > { %p1384_p2 = por %p1383_p7, %p1382_p5 }
  0x17   : > { %p1377_p0 = pnand %p1375_p13, %p1365_p12 }
  0x19   : > { %p1378_p3 = pneg %p1377_p0 }
  0x1b   : > { %p1385_p6 = pnand %p1384_p2, %p1378_p3 }
  0x1d   : > { %1388 = shalt.err (!%p1385_p6)
}
  0x1e   : > { %s1536_s5 = smov 64   ;;  %s1537_s6 = smov 4  }
  0x1f   : > { %s1866_s2 = sld [smem:[#allocation16_spill]]  ;;  %p37_p2 = scmp.ge.s32.totalorder %s35_s29, 2 }
  0x20   : > { %s42_s9 = sadd.s32 1, %s1521_s17  ;;  %p49_p6 = scmp.ne.s32.totalorder %s1521_s17, %s1517_s16 }
  0x21   : > { %p50_p9 = scmp.eq.s32.totalorder %s1533_s20, 0  ;;  %s1881_s29 = smov (%p37_p2, %s35_s29), 0 }
  0x22   : > { %1867 = sst [smem:[#allocation15_spill]] %s1881_s29  ;;  %p1869_p13 = scmp.eq.s32.totalorder %s1605_s21, 1 }
  0x23   : > { %p1651_p12 = por %p50_p9, %p49_p6  ;;  %s39_s12 = ssub.s32 %s1529_s19, %s1881_s29 }
  0x24   : > { %p1657_p0 = por %p1869_p13, %p49_p6  ;;  %p40_p3 = scmp.eq.s32.totalorder %s39_s12, 0 }
  0x25   : > { %1260 = dma.hbm_to_vmem [thread:$0]  (!%p1633_p11), %s1866_s2, 768, %s177_s27, [#allocation8], %s1536_s5, %s1536_s5, %s1537_s6  }
  0x26   : > { %p1273_p11 = scmp.lt.s32.totalorder %s1533_s20, 2  ;;  %s193_s13 = sand.u32 1, %s1521_s17  }
  0x27   : > { %s1109_s14 = sshll.u32 %s193_s13, 2  ;;  %s1110_s26 = sshll.u32 %s1529_s19, 6 }
  0x28   : > { %s1666_s22 = scalar_select %p40_p3, %s1521_s17, %s42_s9  }
  0x29   : > { %s202_s30 = scalar_lea.hbm %s1855_s0, %s1110_s26  ;;  %s197_s5 = scalar_lea.vmem [#allocation4], %s1109_s14 }
  0x2a   : > { %s204_s6 = sshll.u32 %s197_s5, 4  ;;  %p1674_p5 = pnand %p1273_p11, %p1651_p12  ;;  %s205_s6 = int_to_ptr.vmem [resolvable:$true] %s204_s6 }
  0x2b   : > { %s1681_s9 = scalar_lea.hbm %s1856_s1, %s1110_s26  ;;  %s211_s12 = sand.u32 1, %s1533_s20  }
  0x2c   : > { %s194_s29 = scalar_lea.sflag [#allocation5], %s193_s13  ;;  %p1391_p7 = pneg %p1674_p5 }
  0x2d   : > { %s1402_s27 = scalar_lea.vmem %s205_s6, 64  ;;  %s1538_s10 = smov [#allocation4]  }
  0x2e   : > { %p1403_p2 = scmp.ne.s32.totalorder %s205_s6, %s1402_s27  ;;  %s1407_s28 = sshll.u32 %s1538_s10, 4  ;;  %s1408_s28 = int_to_ptr.vmem [resolvable:$false] %s1407_s28 }
  0x2f   : > { %s1409_s5 = scalar_lea.vmem %s1408_s28, 128  ;;  %p1410_p12 = scmp.lt.s32.totalorder %s205_s6, %s1408_s28 }
  0x30   : > { %p1405_p6 = pnand %p1403_p2, %p1391_p7  ;;  %p1411_p13 = scmp.lt.s32.totalorder %s1409_s5, %s1402_s27 }
  0x32   : > { %p1406_p9 = pneg %p1405_p6  ;;  %p1412_p11 = por %p1411_p13, %p1410_p12 }
  0x34   : > { %p1413_p3 = pnand %p1412_p11, %p1406_p9 }
  0x36   : > { %1416 = shalt.err (!%p1413_p3)
}
  0x37   : > { %1264 = dma.hbm_to_vmem [thread:$0]  (!%p1674_p5), %s202_s30, 64, %s205_s6, %s194_s29  }
  0x38   : > { %s215_s2 = scalar_lea.vmem [#allocation7], %s1109_s14  ;;  %s212_s26 = scalar_lea.sflag [#allocation8], %s211_s12 }
  0x39   : > { %s223_s13 = sshll.u32 %s215_s2, 4  ;;  %s1539_s10 = smov [#allocation7]   ;;  %s224_s13 = int_to_ptr.vmem [resolvable:$true] %s223_s13 }
  0x3a   : > { %s1430_s8 = scalar_lea.vmem %s224_s13, 64  ;;  %s1435_s28 = sshll.u32 %s1539_s10, 4  ;;  %s1436_s28 = int_to_ptr.vmem [resolvable:$false] %s1435_s28 }
  0x3b   : > { %p1431_p2 = scmp.ne.s32.totalorder %s224_s13, %s1430_s8  ;;  %s1437_s27 = scalar_lea.vmem %s1436_s28, 128 }
  0x3c   : > { %p1438_p9 = scmp.lt.s32.totalorder %s224_s13, %s1436_s28  ;;  %p1439_p12 = scmp.lt.s32.totalorder %s1437_s27, %s1430_s8 }
  0x3d   : > { %p1433_p6 = pnand %p1431_p2, %p1391_p7 }
  0x3e   : > { %p1440_p13 = por %p1439_p12, %p1438_p9 }
  0x3f   : > { %p1434_p10 = pneg %p1433_p6 }
  0x41   : > { %p1441_p11 = pnand %p1440_p13, %p1434_p10 }
  0x43   : > { %1444 = shalt.err (!%p1441_p11)
}
  0x44   : > { %1267 = dma.hbm_to_vmem [thread:$0]  (!%p1674_p5), %s1681_s9, 64, %s224_s13, %s212_s26  }
  0x45   : > { %232 = sbr.rel (%p1624_p8) target bundleno = 1111 (0x457), region = 36  ;;  %s1700_s29 = sand.u32 (!%p1624_p8), 1, %s1517_s16  }
  0x46   : > { %s1114_s14 = sshll.u32 (!%p1624_p8), %s1700_s29, 2  ;;  %s235_s30 = scalar_lea.sflag (!%p1624_p8), [#allocation5], %s1700_s29 }
  0x47   : > { %s238_s6 = scalar_lea.vmem (!%p1624_p8), [#allocation4], %s1114_s14 }
  0x4a   : > { %1496 = dma.done.wait (%p1614_p4), %s235_s30, 64  }
  0x4b   : > { %1498 = vsyncadd (%p1614_p4), %s235_s30, 4294967232  ;;  %s243_s7 = sand.u32 1, %s1605_s21   ;;  %s247_s25 = scalar_lea.vmem [#allocation7], %s1114_s14 }
  0x4c   : > { %s244_s9 = scalar_lea.sflag [#allocation8], %s243_s7 }
  0x4d   : > { %1500 = dma.done.wait (%p1614_p4), %s244_s9, 64  }
  0x4e   : > { %1502 = vsyncadd (%p1614_p4), %s244_s9, 4294967232 }
  0x4f   : > { %1504 = dma.done.wait (%p56_p1), [#allocation8], 768  }
  0x50   : > { %1506 = vsyncadd (%p56_p1), [#allocation8], 4294966528  ;;  %v1540_v0 = vmov 0.0   ;;  %vm1541_vm0 = vmmov 0   ;;  %v1335_v1 = vld [vmem:[#allocation9 + $0x18] sm:$0xff]   ;;  %v1336_v2 = vld [vmem:[#allocation9 + $0x10] sm:$0xff]  }
  0x51   : > { %1175 = vmatprep.subr.bf16.mxu0 %v1540_v0  ;;  %1179 = vmatprep.mubr.msk.bf16.mxu0 %vm1541_vm0, %v1540_v0  ;;  %v286_v3 = vld [vmem:[%s238_s6] sm:$0xf]  ;;  %vm312_vm1 = vcmask 261120   ;;  %v1337_v4 = vld [vmem:[#allocation9 + $0x8] sm:$0xff]   ;;  %v1338_v5 = vld [vmem:[#allocation9] sm:$0xff]   ;;  %vm422_vm2 = vcmask 257024  }
  0x52   : > { %1183 = vmatprep.subr.bf16.mxu1 %v1540_v0  ;;  %1187 = vmatprep.mubr.msk.bf16.mxu1 %vm1541_vm0, %v1540_v0  ;;  %v426_v6 = vld [vmem:[%s247_s25] sm:$0xf]  ;;  %v1339_v7 = vld [vmem:[#allocation9 + $0x28] sm:$0xff]   ;;  %v1340_v8 = vld [vmem:[#allocation9 + $0x20] sm:$0xff]   ;;  %vm497_vm3 = vcmask 64512   ;;  %s1542_s2 = smov 112  }
  0x53   : > { %1176 = vmatpush3.bf16.msra.mxu0 %v1335_v1  ;;  %1184 = vmatpush3.bf16.msra.mxu1 %v1339_v7  ;;  %v1119_v9 = vld [vmem:[%s1858_s3 + $0x1] ss:$0 sm:$0xff]  ;;  %v1128_v16 = vld [vmem:[%s1858_s3] ss:$0 sm:$0xff]  ;;  %s1543_s13 = smov 120   ;;  %s1544_s26 = smov 104  }
  0x54   : > { %1177 = vmatprep.subr.bf16.mxu0 %v1540_v0  ;;  %1185 = vmatprep.subr.bf16.mxu1 %v1540_v0  ;;  %v1124_v28 = vld [vmem:[%s1858_s3 + $0x2] ss:$0 sm:$0xff]  ;;  %vm557_vm4 = vcmask 1043456   ;;  %s1117_s28 = sshll.u32 %s1700_s29, 3  ;;  %s1545_s14 = smov 8   ;;  %vm727_vm5 = vcmask 130112  }
  0x55   : > { %s1801_s27 = scalar_lea.vmem [#allocation10], %s1117_s28  ;;  %s1546_s30 = smov 16   ;;  %vm851_vm6 = vcmask 195712   ;;  %vm975_vm7 = vcmask 261312  }
  0x56   : > { %s1547_s6 = smov 24   ;;  %s1147_s7 = sshll.u32 %s1525_s18, 7 }
  0x57   : > { %1178 = vmatpush3.bf16.msra.mxu0 %v1336_v2  ;;  %1186 = vmatpush3.bf16.msra.mxu1 %v1340_v8  ;;  %s992_s9 = sshll.u32 %s1801_s27, 4  ;;  %s1812_s23 = scalar_lea.hbm %s1859_s4, %s1147_s7  ;;  %s993_s9 = int_to_ptr.vmem [resolvable:$true] %s992_s9 }
  0x58   : > { %1191 = vmatprep.subr.bf16.mxu0 %v1540_v0  ;;  %1199 = vmatprep.subr.bf16.mxu1 %v1540_v0  ;;  %s978_s12 = scalar_lea.sflag [#allocation6], %s1700_s29  ;;  %s1445_s5 = scalar_lea.vmem %s993_s9, 128 }
  0x59   : > { %p1446_p1 = scmp.ne.s32.totalorder %s993_s9, %s1445_s5 }
  0x5a   : > { %1180 = vmatmul.mubr.msk.bf16.vlgmr.msra.gmra.mxu0 %vm312_vm1, %v286_v3  ;;  %1188 = vmatmul.mubr.msk.bf16.vlgmr.msra.gmra.mxu1 %vm312_vm1, %v286_v3 }
  0x5b   : > { %1192 = vmatpush3.bf16.msra.mxu0 %v1337_v4  ;;  %1195 = vmatprep.mubr.msk.bf16.mxu0 %vm1541_vm0, %v1540_v0  ;;  %p1447_p4 = pnand %p1446_p1, %p1657_p0 }
  0x5c   : > { %1193 = vmatprep.subr.bf16.mxu0 %v1540_v0  ;;  %1201 = vmatprep.mubr.msk.bf16.mxu1 %vm1541_vm0, %v1540_v0 }
  0x5d   : > { %p1448_p8 = pneg %p1447_p4 }
  0x5f   : > { %1194 = vmatpush3.bf16.msra.mxu0 %v1338_v5 }
  0x60   : > { %1205 = vmatprep.subr.bf16.mxu0 %v1540_v0 }
  0x62   : > { %1196 = vmatmul.mubr.msk.bf16.vlgmr.msra.gmra.mxu0 %vm312_vm1, %v426_v6 }
  0x63   : > { %1207 = vmatprep.mubr.msk.bf16.mxu0 %vm1541_vm0, %v1540_v0 }
 0x11a   : > { %v350_v10 = vpop.f32.mrf.mxu0  ;;  %v415_v29 = vpop.f32.mrf.mxu1 }
 0x11b   : > { %v351_v11 = vadd.f32 %v1119_v9, %v350_v10  ;;  %v416_v30 = vadd.f32 %v1124_v28, %v415_v29 }
 0x11c   : > { %v1181_v12 = vpop.f32.mrf.mxu0  ;;  %v1189_v31 = vpop.f32.mrf.mxu1 }
 0x11d   : > { %v421_v13 = vpack.c.bf16 %v351_v11, %v351_v11  ;;  %v424_v32 = vpack.c.bf16 %v416_v30, %v416_v30 }
 0x11e   : > { %v353_v14 = vpop.f32.mrf.mxu0  ;;  %v418_v33 = vpop.f32.mrf.mxu1 }
 0x11f   : > { %423 = vst.msk [vmem:[#allocation2] sm:$0xf] %vm422_vm2, %v421_v13  ;;  %425 = vst.msk [vmem:[#allocation3] sm:$0xf] %vm422_vm2, %v424_v32 }
 0x120   : > { %v1182_v15 = vpop.f32.mrf.mxu0  ;;  %v1190_v34 = vpop.f32.mrf.mxu1 }
 0x122   : > { %v488_v17 = vpop.f32.mrf.mxu0 }
 0x123   : > { %v489_v18 = vadd.f32 %v1128_v16, %v488_v17 }
 0x124   : > { %v1197_v19 = vpop.f32.mrf.mxu0 }
 0x125   : > { %v494_v25 = vpack.c.bf16 %v489_v18, %v489_v18 }
 0x126   : > { %v495_v20 = vld [vmem:[#allocation2] sm:$0xf]  ;;  %v491_v22 = vpop.f32.mrf.mxu0  ;;  %v496_v35 = vld [vmem:[#allocation3] sm:$0xf] }
 0x127   : > { %v1341_v21 = vld [vmem:[#allocation2] ss:$0 sps:$4 sm:$0xff]   ;;  %v502_v23 = vsel %vm497_vm3, %v495_v20, 0  ;;  %v559_v36 = vsel %vm557_vm4, %v496_v35, 0  ;;  %v1344_v63 = vld [vmem:[#allocation3] ss:$0 sps:$4 sm:$0xff]  }
 0x128   : > { %v1342_v24 = vld [vmem:[#allocation2] ss:$0 sps:$4 sm:$0xff]   ;;  %1200 = vmatpush3.bf16.xpose.msra.mxu1 %v502_v23  ;;  %736 = vrot.lane.b32.xlu1 %v1341_v21, %s1542_s2  ;;  %v1198_v26 = vpop.f32.mrf.mxu0  ;;  %v1345_v3 = vld [vmem:[#allocation3] ss:$0 sps:$4 sm:$0xff]  }
 0x129   : > { %612 = vrot.lane.b32.xlu0 %v1342_v24, %s1543_s13  ;;  %1211 = vmatprep.subr.bf16.mxu1 %v1540_v0  ;;  %v1343_v27 = vld [vmem:[#allocation2] ss:$0 sps:$4 sm:$0xff]   ;;  %v1346_v8 = vld [vmem:[#allocation3] ss:$0 sps:$4 sm:$0xff]  }
 0x12a   : > { %1206 = vmatpush3.bf16.msra.mxu0 %v559_v36 }
 0x12b   : > { %1217 = vmatprep.subr.bf16.mxu0 %v1540_v0 }
 0x12c   : > { %731 = vrot.lane.b32.xlu1 %v494_v25, %s1542_s2 }
 0x12d   : > { %607 = vrot.lane.b32.xlu0 %v494_v25, %s1543_s13 }
 0x12f   : > { %1202 = vmatmul.mubr.msk.bf16.vlgmr.msra.gmra.mxu1 %vm497_vm3, %v494_v25 }
 0x130   : > { %855 = vrot.lane.b32.xlu1 %v494_v25, %s1544_s26  ;;  %1213 = vmatprep.mubr.msk.bf16.mxu1 %vm1541_vm0, %v1540_v0 }
 0x131   : > { %860 = vrot.lane.b32.xlu0 %v1343_v27, %s1544_s26 }
 0x19a   : > { %v737_v39 = vpop.permute.xlu1 %736 }
 0x19b   : > { %v613_v37 = vpop.permute.xlu0 %612  ;;  %v742_v41 = vsel %vm497_vm3, %v737_v39, 0 }
 0x19c   : > { %v618_v38 = vsel %vm497_vm3, %v613_v37, 0 }
 0x19d   : > { %1212 = vmatpush3.bf16.xpose.msra.mxu1 %v618_v38 }
 0x19e   : > { %1223 = vmatprep.subr.bf16.mxu1 %v1540_v0  ;;  %v732_v43 = vpop.permute.xlu1 %731 }
 0x19f   : > { %v608_v40 = vpop.permute.xlu0 %607 }
 0x1a2   : > { %v856_v45 = vpop.permute.xlu1 %855 }
 0x1a3   : > { %v861_v42 = vpop.permute.xlu0 %860 }
 0x1a4   : > { %1214 = vmatmul.mubr.msk.bf16.vlgmr.msra.gmra.mxu1 %vm497_vm3, %v608_v40  ;;  %v866_v44 = vsel %vm497_vm3, %v861_v42, 0 }
 0x1a5   : > { %1224 = vmatpush3.bf16.xpose.msra.mxu1 %v742_v41  ;;  %1225 = vmatprep.mubr.msk.bf16.mxu1 %vm1541_vm0, %v1540_v0 }
 0x1a6   : > { %1235 = vmatprep.subr.bf16.mxu1 %v1540_v0 }
 0x1ac   : > { %1226 = vmatmul.mubr.msk.bf16.vlgmr.msra.gmra.mxu1 %vm497_vm3, %v732_v43 }
 0x1ad   : > { %1236 = vmatpush3.bf16.xpose.msra.mxu1 %v866_v44  ;;  %1237 = vmatprep.mubr.msk.bf16.mxu1 %vm1541_vm0, %v1540_v0 }
 0x1b4   : > { %1238 = vmatmul.mubr.msk.bf16.vlgmr.msra.gmra.mxu1 %vm497_vm3, %v856_v45 }
 0x1ef   : > { %v538_v46 = vpop.f32.mrf.mxu1 }
 0x1f0   : > { %v544_v47 = vsel %vm497_vm3, %v538_v46, -inf }
 0x1f1   : > { %545 = vmax.xlane.f32.xlu0 %v544_v47  ;;  %v1203_v48 = vpop.f32.mrf.mxu1 }
 0x1f3   : > { %v541_v49 = vpop.f32.mrf.mxu1 }
 0x1f5   : > { %v1204_v50 = vpop.f32.mrf.mxu1 }
 0x264   : > { %v654_v51 = vpop.f32.mrf.mxu1 }
 0x265   : > { %v660_v52 = vsel %vm497_vm3, %v654_v51, -inf }
 0x266   : > { %661 = vmax.xlane.f32.xlu1 %v660_v52  ;;  %v1215_v53 = vpop.f32.mrf.mxu1 }
 0x268   : > { %v657_v54 = vpop.f32.mrf.mxu1 }
 0x26a   : > { %v1216_v55 = vpop.f32.mrf.mxu1 }
 0x26c   : > { %v778_v56 = vpop.f32.mrf.mxu1 }
 0x26d   : > { %v784_v57 = vsel %vm497_vm3, %v778_v56, -inf }
 0x26e   : > { %785 = vmax.xlane.f32.xlu0 %v784_v57  ;;  %v1227_v58 = vpop.f32.mrf.mxu1 }
 0x270   : > { %v781_v59 = vpop.f32.mrf.mxu1 }
 0x272   : > { %v1228_v60 = vpop.f32.mrf.mxu1 }
 0x274   : > { %v902_v61 = vpop.f32.mrf.mxu1 }
 0x275   : > { %v908_v62 = vsel %vm497_vm3, %v902_v61, -inf }
 0x276   : > { %909 = vmax.xlane.f32.xlu0 %v908_v62  ;;  %v1239_v1 = vpop.f32.mrf.mxu1 }
 0x277   : > { %673 = vrot.lane.b32.xlu1 %v1344_v63, %s1543_s13 }
 0x278   : > { %v905_v2 = vpop.f32.mrf.mxu1 }
 0x27a   : > { %v546_v4 = vpop.xlane.xlu0 %545  ;;  %v1240_v5 = vpop.f32.mrf.mxu1 }
 0x27b   : > { %v547_v6 = vsub.f32 %v538_v46, %v546_v4  ;;  %921 = vrot.lane.b32.xlu1 %v1345_v3, %s1544_s26 }
 0x27d   : > { %v548_v7 = vmul.f32 1.442695, %v547_v6 }
 0x27f   : > { %1347 = vpow2.f32 %v548_v7 }
 0x28c   : > { %v1348_v9 = vpop.eup %1347  ;;  %797 = vrot.lane.b32.xlu0 %v1346_v8, %s1542_s2  ;;  %s1548_s2 = smov [#allocation10]  }
 0x28d   : > { %v553_v10 = vpack.c.bf16 %v1348_v9, %v1348_v9  ;;  %v550_v27 = vsel %vm497_vm3, %v1348_v9, 0.0  ;;  %s1449_s13 = sshll.u32 %s1548_s2, 4  ;;  %s1450_s13 = int_to_ptr.vmem [resolvable:$false] %s1449_s13 }
 0x28e   : > { %s1451_s18 = scalar_lea.vmem %s1450_s13, 256  ;;  %p1452_p10 = scmp.lt.s32.totalorder %s993_s9, %s1450_s13 }
 0x28f   : > { %1208 = vmatmul.mubr.msk.bf16.vlgmr.msra.gmra.mxu0 %vm497_vm3, %v553_v10  ;;  %p1453_p5 = scmp.lt.s32.totalorder %s1451_s18, %s1445_s5 }
 0x290   : > { %1219 = vmatprep.mubr.msk.bf16.mxu0 %vm1541_vm0, %v1540_v0 }
 0x291   : > { %p1454_p7 = por %p1453_p5, %p1452_p10 }
 0x293   : > { %p1455_p3 = pnand %p1454_p7, %p1448_p8 }
 0x2ef   : > { %v662_v11 = vpop.xlane.xlu1 %661 }
 0x2f0   : > { %v663_v12 = vsub.f32 %v654_v51, %v662_v11 }
 0x2f2   : > { %v664_v13 = vmul.f32 1.442695, %v663_v12 }
 0x2f3   : > { %v674_v14 = vpop.permute.xlu1 %673 }
 0x2f4   : > { %1349 = vpow2.f32 %v664_v13  ;;  %v679_v15 = vsel %vm557_vm4, %v674_v14, 0 }
 0x2f5   : > { %1218 = vmatpush3.bf16.msra.mxu0 %v679_v15 }
 0x2f6   : > { %1229 = vmatprep.subr.bf16.mxu0 %v1540_v0 }
 0x2f7   : > { %v786_v16 = vpop.xlane.xlu0 %785  ;;  %v922_v29 = vpop.permute.xlu1 %921 }
 0x2f8   : > { %v787_v17 = vsub.f32 %v778_v56, %v786_v16  ;;  %v927_v32 = vsel %vm557_vm4, %v922_v29, 0 }
 0x2fa   : > { %v788_v18 = vmul.f32 1.442695, %v787_v17 }
 0x2fc   : > { %1351 = vpow2.f32 %v788_v18 }
 0x2ff   : > { %v910_v19 = vpop.xlane.xlu0 %909 }
 0x300   : > { %v911_v20 = vsub.f32 %v902_v61, %v910_v19 }
 0x301   : > { %v1350_v21 = vpop.eup %1349 }
 0x302   : > { %v912_v22 = vmul.f32 1.442695, %v911_v20  ;;  %v666_v23 = vsel %vm497_vm3, %v1350_v21, 0.0  ;;  %v669_v24 = vpack.c.bf16 %v1350_v21, %v1350_v21 }
 0x303   : > { %667 = vadd.xlane.f32.xlu1 %v666_v23  ;;  %v798_v25 = vpop.permute.xlu0 %797 }
 0x304   : > { %1353 = vpow2.f32 %v912_v22  ;;  %v803_v26 = vsel %vm557_vm4, %v798_v25, 0  ;;  %1220 = vmatmul.mubr.msk.bf16.vlgmr.msra.gmra.mxu0 %vm497_vm3, %v669_v24 }
 0x305   : > { %1230 = vmatpush3.bf16.msra.mxu0 %v803_v26  ;;  %1231 = vmatprep.mubr.msk.bf16.mxu0 %vm1541_vm0, %v1540_v0 }
 0x306   : > { %1241 = vmatprep.subr.bf16.mxu0 %v1540_v0 }
 0x307   : > { %551 = vadd.xlane.f32.xlu1 %v550_v27 }
 0x309   : > { %v1352_v28 = vpop.eup %1351 }
 0x30a   : > { %v790_v30 = vsel %vm497_vm3, %v1352_v28, 0.0  ;;  %v793_v31 = vpack.c.bf16 %v1352_v28, %v1352_v28 }
 0x30b   : > { %791 = vadd.xlane.f32.xlu0 %v790_v30 }
 0x30c   : > { %1232 = vmatmul.mubr.msk.bf16.vlgmr.msra.gmra.mxu0 %vm497_vm3, %v793_v31 }
 0x30d   : > { %1242 = vmatpush3.bf16.msra.mxu0 %v927_v32  ;;  %1243 = vmatprep.mubr.msk.bf16.mxu0 %vm1541_vm0, %v1540_v0 }
 0x311   : > { %v1354_v33 = vpop.eup %1353 }
 0x312   : > { %v914_v34 = vsel %vm497_vm3, %v1354_v33, 0.0  ;;  %v917_v35 = vpack.c.bf16 %v1354_v33, %v1354_v33 }
 0x313   : > { %915 = vadd.xlane.f32.xlu0 %v914_v34 }
 0x314   : > { %1244 = vmatmul.mubr.msk.bf16.vlgmr.msra.gmra.mxu0 %vm497_vm3, %v917_v35 }
 0x34f   : > { %v595_v36 = vpop.f32.mrf.mxu0 }
 0x351   : > { %v1209_v37 = vpop.f32.mrf.mxu0 }
 0x353   : > { %v598_v38 = vpop.f32.mrf.mxu0 }
 0x355   : > { %v1210_v39 = vpop.f32.mrf.mxu0 }
 0x38c   : > { %v668_v40 = vpop.xlane.xlu1 %667 }
 0x390   : > { %v552_v41 = vpop.xlane.xlu1 %551 }
 0x391   : > { %1355 = vrcp.f32 %v552_v41 }
 0x392   : > { %1357 = vrcp.f32 %v668_v40 }
 0x394   : > { %v792_v0 = vpop.xlane.xlu0 %791 }
 0x395   : > { %1359 = vrcp.f32 %v792_v0 }
 0x39c   : > { %v916_v45 = vpop.xlane.xlu0 %915 }
 0x39d   : > { %1361 = vrcp.f32 %v916_v45 }
 0x39e   : > { %v1356_v42 = vpop.eup %1355 }
 0x39f   : > { %v602_v43 = vmul.f32 %v1356_v42, %v595_v36  ;;  %v1358_v44 = vpop.eup %1357 }
 0x3a1   : > { %603 = vst.msk [vmem:[%s1801_s27] sm:$0xff] %vm497_vm3, %v602_v43 }
 0x3a2   : > { %v1360_v51 = vpop.eup %1359 }
 0x3aa   : > { %v1362_v57 = vpop.eup %1361 }
 0x3c4   : > { %v715_v46 = vpop.f32.mrf.mxu0 }
 0x3c5   : > { %v722_v47 = vmul.f32 %v1358_v44, %v715_v46 }
 0x3c6   : > { %v1221_v48 = vpop.f32.mrf.mxu0 }
 0x3c7   : > { %724 = vrot.lane.b32.xlu0 %v722_v47, %s1545_s14 }
 0x3c8   : > { %v718_v49 = vpop.f32.mrf.mxu0 }
 0x3ca   : > { %v1222_v50 = vpop.f32.mrf.mxu0 }
 0x3cc   : > { %v839_v52 = vpop.f32.mrf.mxu0 }
 0x3cd   : > { %v846_v53 = vmul.f32 %v1360_v51, %v839_v52 }
 0x3ce   : > { %v1233_v54 = vpop.f32.mrf.mxu0 }
 0x3cf   : > { %848 = vrot.lane.b32.xlu1 %v846_v53, %s1546_s30 }
 0x3d0   : > { %v842_v55 = vpop.f32.mrf.mxu0 }
 0x3d2   : > { %v1234_v56 = vpop.f32.mrf.mxu0 }
 0x3d4   : > { %v963_v58 = vpop.f32.mrf.mxu0 }
 0x3d5   : > { %v970_v59 = vmul.f32 %v1362_v57, %v963_v58 }
 0x3d6   : > { %v1245_v60 = vpop.f32.mrf.mxu0 }
 0x3d7   : > { %972 = vrot.lane.b32.xlu1 %v970_v59, %s1547_s6 }
 0x3d8   : > { %v966_v61 = vpop.f32.mrf.mxu0 }
 0x3da   : > { %v1246_v62 = vpop.f32.mrf.mxu0 }
 0x439   : > { %v725_v63 = vpop.permute.xlu0 %724 }
 0x43a   : > { %728 = vst.msk [vmem:[%s1801_s27] sm:$0xff] %vm727_vm5, %v725_v63 }
 0x441   : > { %v849_v1 = vpop.permute.xlu1 %848 }
 0x442   : > { %852 = vst.msk [vmem:[%s1801_s27] sm:$0xff] %vm851_vm6, %v849_v1 }
 0x449   : > { %v973_v2 = vpop.permute.xlu1 %972 }
 0x44a   : > { %976 = vst.msk [vmem:[%s1801_s27] sm:$0xff] %vm975_vm7, %v973_v2 }
 0x44b   : > { %1458 = shalt.err (!%p1455_p3)
}
 0x44c   : > { %s1459_s26 = scalar_lea.hbm %s1812_s23, 128  ;;  %s1463_s10 = scalar_lea.hbm %s1859_s4, 256 }
 0x44d   : > { %p1460_p2 = scmp.ne.s32.totalorder %s1812_s23, %s1459_s26  ;;  %p1464_p12 = scmp.lt.s32.totalorder %s1812_s23, %s1859_s4 }
 0x44e   : > { %p1465_p13 = scmp.lt.s32.totalorder %s1463_s10, %s1459_s26 }
 0x44f   : > { %p1461_p6 = pnand %p1460_p2, %p1657_p0 }
 0x450   : > { %p1466_p11 = por %p1465_p13, %p1464_p12 }
 0x451   : > { %p1462_p9 = pneg %p1461_p6 }
 0x453   : > { %p1467_p1 = pnand %p1466_p11, %p1462_p9 }
 0x455   : > { %1470 = shalt.err (!%p1467_p1)
}
 0x456   : > { %1255 = dma.vmem_to_hbm [thread:$0]  (%p1657_p0), %s993_s9, 128, %s1812_s23, %s978_s12  }
 0x457 PF: > { %s1004_s14 = sand.u32 1, %s1513_s15   ;;  %p1872_p4 = scmp.ne.s32.totalorder %s1863_s24, 0 }
 0x458   : > { %p1873_p8 = scmp.ge.s32.totalorder %s1533_s20, 2  ;;  %s1005_s30 = scalar_lea.sflag [#allocation6], %s1004_s14 }
 0x45a   : > { %p1269_p10 = pnand %p1873_p8, %p1872_p4 }
 0x45c   : > { %p1270_p5 = pneg %p1269_p10 }
 0x45e   : > { %1508 = dma.done.wait (%p1270_p5), %s1005_s30, 128  }
 0x45f   : > { %1510 = vsyncadd (%p1270_p5), %s1005_s30, 4294967168  ;;  %s23_s20 = sadd.s32 1, %s1533_s20   ;;  %s1874_s11 = sld [smem:[#allocation15_spill]] }
 0x460   : > { %p20_p7 = scmp.ge.s32.totalorder %s23_s20, 4   ;;  %s1875_s15 = smov %s1517_s16 }
 0x461   : > { %s1876_s16 = smov %s1521_s17  ;;  %s1877_s17 = smov %s1666_s22 }
 0x462   : > { %s1878_s18 = smov %s1529_s19  ;;  %22 = sbr.rel (!%p20_p7) target bundleno = 10 (0xa), region = 106 }
 0x465   : > { %s1879_s19 = smov %s1874_s11 }
 0x467   :  { %1010 = vsyncpa [#allocation5], 1 }
 0x468   :  { %1012 = vsyncpa [#allocation5 + $0x1], 1 }
 0x469   :  { %1013 = vsyncpa [#allocation8], 1 }
 0x46a   :  { %1015 = vsyncpa [#allocation8 + $0x1], 1 }
 0x46b   :  { %1016 = vsyncpa [#allocation6], 1 }
 0x46c   :  { %1018 = vsyncpa [#allocation6 + $0x1], 1 }

</bundles_post_ra>
